<compile_context>
chip_gen: v7x
topology: tpu7x:2x2x1
jax: 0.10.0
libtpu: 0.0.40
codegen_flags: <defaults>
</compile_context>

<pallas_src>
import functools

import jax
import jax.numpy as jnp
from jax.experimental import pallas as pl
from jax.experimental.pallas import tpu as pltpu


def _round_up(x, m):
    return (x + m - 1) // m * m


def _vmem_capacity_bytes():
    """Physical VMEM per TensorCore (128 MiB v5e/v6e, 64 MiB v7x)."""
    try:
        info = pltpu.get_tpu_info()
        cap = getattr(info, "vmem_capacity_bytes", None)
        if cap:
            return int(cap)
    except Exception:
        pass
    return 128 << 20


def _choose_tile(dim_pad, target, max_waste_frac=0.09):
    """Pick a tile for a 128-aligned dim.

    Prefers the largest power-of-two tile <= target and pads the dim UP to a
    multiple of that tile (instead of requiring the tile to divide the dim),
    as long as the extra zero padding stays under ~9%.  Falls back to 128,
    which is always waste-free since dim_pad is already a multiple of 128.
    Returns (tile, padded_dim) with padded_dim % tile == 0.
    """
    if dim_pad <= target:
        return dim_pad, dim_pad            # single block, no extra padding
    c = target
    while c >= 256:
        padded = _round_up(dim_pad, c)
        if padded - dim_pad <= max_waste_frac * dim_pad:
            return c, padded
        c //= 2
    return 128, dim_pad


def _matmul_sigmoid_sum_kernel(x_ref, wt_ref, b_ref, o_ref, acc_ref,
                               *, x_resident, tk):
    # x_ref  : (tb, I_pad) if x_resident else (tb, tk)
    # wt_ref : (tk, th)   b_ref: (1, th)
    # o_ref  : (1, 1, tb) per-(H-tile, B-tile) partial row-sum (lane-dense in B)
    # acc_ref: (tb, th) f32 partial-z accumulator
    k = pl.program_id(2)                     # I (contraction) tile, innermost
    nk = pl.num_programs(2)

    @pl.when(k == 0)
    def _():
        # Fold the bias add into the accumulator init (broadcast over B tile).
        acc_ref[...] = jnp.broadcast_to(
            b_ref[...].astype(jnp.float32), acc_ref.shape)

    if x_resident:
        # x panel is resident across the whole (j, k) loop; slice the k chunk.
        xk = x_ref[:, pl.ds(pl.multiple_of(k * tk, tk), tk)]
    else:
        xk = x_ref[...]

    acc_ref[...] += jax.lax.dot_general(
        xk.astype(wt_ref.dtype), wt_ref[...],
        dimension_numbers=(((1,), (0,)), ((), ())),
        preferred_element_type=jnp.float32,
    )

    @pl.when(k == nk - 1)
    def _():
        # Clamp so exp(-z) never overflows to inf (sigmoid(-80) ~ 1.8e-35 ~ 0,
        # so the clamp does not change the sum).  Padded hidden columns carry
        # bias = -80 and therefore contribute ~0.
        z = jnp.maximum(acc_ref[...], -80.0)
        # Sigmoid on the EUP: exp + approximate reciprocal (no VALU divide).
        # approx=True has ~2^-12 rel. error; use jax.nn.sigmoid for bit parity.
        s = pl.reciprocal(1.0 + jnp.exp(-z), approx=True)
        # Lane-dense (1, tb) row-sum via a tiny MXU matvec (contract over th).
        # TODO(synk): if the epilogue ever shows on the critical path for
        # th >= 1024, switch to an XLU jnp.sum(s, axis=1) reduction instead.
        ones_row = jnp.ones((1, s.shape[1]), jnp.float32)
        partial = jax.lax.dot_general(
            ones_row, s,
            dimension_numbers=(((1,), (1,)), ((), ())),
            preferred_element_type=jnp.float32,
        )  # (1, tb)
        o_ref[...] = partial.reshape(o_ref.shape).astype(o_ref.dtype)


def matmul_sigmoid_sum(x, weight_t, bias):
    """out[i] = sum_h sigmoid( (x @ weight_t)[i, h] + bias[h] ), shape (B, 1).

    x: (B, I) f32, weight_t: (I, H) (pre-transposed weights, f32 or bf16),
    bias: (H,) f32.
    """
    B, I = x.shape
    I2, H = weight_t.shape
    assert I == I2 and bias.shape == (H,)

    # ---- generation-aware VMEM budget -------------------------------------
    vmem_cap = _vmem_capacity_bytes()
    budget = min(int(vmem_cap * 0.65), 96 << 20)   # ~83 MiB v5e/v6e, ~41 MiB v7x

    # ---- tile selection -----------------------------------------------------
    B_pad = _round_up(B, 8)
    tb = B_pad if B_pad <= 256 else 256
    B_pad = _round_up(B_pad, tb)

    I_pad0 = _round_up(I, 128)
    H_pad0 = _round_up(H, 128)

    wt_itemsize = jnp.dtype(weight_t.dtype).itemsize

    # Start from large weight-stream tiles (amortize ~0.35us/step overhead) and
    # shrink until the double-buffered W^T stream + f32 accumulator leave at
    # least half the budget for a resident x panel.
    tk_t, th_t = 2048, 1024
    while (2 * tk_t * th_t * wt_itemsize + tb * th_t * 4) > budget // 2:
        if th_t > 256:
            th_t //= 2
        elif tk_t > 256:
            tk_t //= 2
        else:
            break

    tk, I_pad = _choose_tile(I_pad0, tk_t)   # contraction tile
    th, H_pad = _choose_tile(H_pad0, th_t)   # hidden tile

    w_bytes = 2 * tk * th * wt_itemsize                   # double-buffered W^T
    acc_bytes = tb * th * 4                                # f32 z accumulator
    misc_bytes = 2 * th * 4 + 4 * tb * 4 + (256 << 10)     # bias + out + slop
    fixed_bytes = w_bytes + acc_bytes + misc_bytes

    # Keep the x panel resident across the whole H loop when it fits in VMEM
    # (otherwise it would be re-streamed from HBM H_pad/th times).
    x_res_bytes = 2 * tb * I_pad * 4
    x_resident = (fixed_bytes + x_res_bytes) <= budget
    x_bytes = x_res_bytes if x_resident else 2 * tb * tk * 4
    total_bytes = fixed_bytes + x_bytes
    vmem_limit = int(min(vmem_cap, max(total_bytes + (8 << 20), 32 << 20)))

    # ---- zero-pad to tile multiples (padding never changes the result) -----
    xp = x
    if (B_pad, I_pad) != (B, I):
        xp = jnp.zeros((B_pad, I_pad), x.dtype).at[:B, :I].set(x)
    wtp = weight_t
    if (I_pad, H_pad) != (I, H):
        wtp = jnp.zeros((I_pad, H_pad), weight_t.dtype).at[:I, :H].set(weight_t)
    bp = bias.astype(jnp.float32)
    if H_pad != H:
        # Padded hidden units get a large negative bias -> sigmoid ~= 0.
        bp = jnp.full((H_pad,), -80.0, jnp.float32).at[:H].set(bp)
    bias2d = bp.reshape(1, H_pad)

    nb, nh, nk = B_pad // tb, H_pad // th, I_pad // tk
    grid = (nb, nh, nk)

    if x_resident:
        x_spec = pl.BlockSpec((tb, I_pad), lambda i, j, k: (i, 0))
    else:
        x_spec = pl.BlockSpec((tb, tk), lambda i, j, k: (i, k))

    kernel = functools.partial(
        _matmul_sigmoid_sum_kernel, x_resident=x_resident, tk=tk)

    partials = pl.pallas_call(
        kernel,
        out_shape=jax.ShapeDtypeStruct((nh, 1, B_pad), jnp.float32),
        grid_spec=pltpu.PrefetchScalarGridSpec(
            num_scalar_prefetch=0,
            grid=grid,
            in_specs=[
                x_spec,                                          # x
                pl.BlockSpec((tk, th), lambda i, j, k: (k, j)),  # W^T
                pl.BlockSpec((1, th), lambda i, j, k: (0, j)),   # bias
            ],
            # Per-(H-tile, B-tile) partial row-sums: keeps the H grid axis
            # "parallel" (both v7x TensorCores busy even for a single B tile)
            # and stays lane-dense along B.
            out_specs=pl.BlockSpec((1, 1, tb), lambda i, j, k: (j, 0, i)),
            scratch_shapes=[
                pltpu.VMEM((tb, th), jnp.float32),   # z accumulator
            ],
        ),
        compiler_params=pltpu.CompilerParams(
            dimension_semantics=("parallel", "parallel", "arbitrary"),
            vmem_limit_bytes=vmem_limit,
        ),
    )(xp, wtp, bias2d)

    # Tiny (nh, B_pad) finish-sum in XLA.  Padded batch rows contain garbage
    # (sum of sigmoid(bias)) and are sliced off here -- never trust them.
    out = jnp.sum(partials[:, 0, :], axis=0)
    return out[:B].reshape(B, 1).astype(x.dtype)


class ModelNew:
    """JAX/Pallas port of the PyTorch ModelNew (Linear -> sigmoid -> sum over hidden)."""

    def __init__(self, input_size, hidden_size, key, weight_dtype=jnp.float32):
        # Deterministic init mimicking nn.Linear: U(-1/sqrt(in), 1/sqrt(in)).
        kw, kb = jax.random.split(key)
        bound = 1.0 / (input_size ** 0.5)
        weight = jax.random.uniform(
            kw, (hidden_size, input_size), jnp.float32, -bound, bound)
        # Store the weight pre-transposed (I, H): static, so this is free and
        # gives the kernel the canonical (M,K)x(K,N) MXU layout.
        # weight_dtype=jnp.bfloat16 halves the (bandwidth-bound) weight stream
        # at a small accuracy cost; default f32 keeps parity with the reference.
        self.weight_t = jnp.transpose(weight).astype(weight_dtype)
        self.bias = jax.random.uniform(
            kb, (hidden_size,), jnp.float32, -bound, bound)

    def __call__(self, x):
        return matmul_sigmoid_sum(x, self.weight_t, self.bias)


if __name__ == "__main__":
    key = jax.random.PRNGKey(0)
    k_m1, k_x1, k_m2, k_x2, k_m3, k_x3 = jax.random.split(key, 6)

    def ref_fn(model, x):
        z = x @ model.weight_t.astype(jnp.float32) + model.bias
        return jnp.sum(jax.nn.sigmoid(z), axis=-1, keepdims=True)

    # 1) Small shape consistent with the module (single-block grid).
    B1, I1, H1 = 2, 32, 32
    m1 = ModelNew(I1, H1, k_m1)
    x1 = jax.random.normal(k_x1, (B1, I1), jnp.float32)
    o1 = jax.block_until_ready(m1(x1))
    assert o1.shape == (B1, 1)
    assert jnp.allclose(o1, ref_fn(m1, x1), rtol=1e-2, atol=1e-3), (o1, ref_fn(m1, x1))

    # 2) Non-128-aligned shape: exercises the zero-padding paths.
    B2, I2, H2 = 5, 300, 300
    m2 = ModelNew(I2, H2, k_m2)
    x2 = jax.random.normal(k_x2, (B2, I2), jnp.float32)
    o2 = jax.block_until_ready(m2(x2))
    assert o2.shape == (B2, 1)
    assert jnp.allclose(o2, ref_fn(m2, x2), rtol=1e-2, atol=1e-3), (o2, ref_fn(m2, x2))

    # 3) Moderate awkward shape: multi-tile grid (nh > 1, nk > 1), resident x,
    #    parallel H axis and the wrapper-side partial-sum finish.
    B3, I3, H3 = 10, 2200, 1100
    m3 = ModelNew(I3, H3, k_m3)
    x3 = jax.random.normal(k_x3, (B3, I3), jnp.float32)
    o3 = jax.block_until_ready(m3(x3))
    assert o3.shape == (B3, 1)
    assert jnp.allclose(o3, ref_fn(m3, x3), rtol=1e-2, atol=1e-2), (o3, ref_fn(m3, x3))

    print("KERNEL_OK")
</pallas_src>

<mosaic_0001>
module attributes {stable_mosaic.version = 11 : i64} {
  func.func @_matmul_sigmoid_sum_kernel(%arg0: i32, %arg1: i32, %arg2: i32, %arg3: memref<8x128xf32, #tpu.memory_space<vmem>>, %arg4: memref<128x128xf32, #tpu.memory_space<vmem>>, %arg5: memref<1x128xf32, #tpu.memory_space<vmem>>, %arg6: memref<1x1x8xf32, #tpu.memory_space<vmem>>, %arg7: memref<8x128xf32, #tpu.memory_space<vmem>>) attributes {dimension_semantics = [#tpu.dimension_semantics<parallel>, #tpu.dimension_semantics<parallel>, #tpu.dimension_semantics<arbitrary>], iteration_bounds = array<i64: 1, 1, 1>, scalar_prefetch = 0 : i64, scratch_operands = 1 : i64, tpu.core_type = #tpu.core_type<tc>, window_params = [{transform_indices = @transform_0, window_bounds = array<i64: 8, 128>}, {transform_indices = @transform_1, window_bounds = array<i64: 128, 128>}, {transform_indices = @transform_2, window_bounds = array<i64: 1, 128>}, {transform_indices = @transform_3, window_bounds = array<i64: 1, 1, 8>}]} {
    %c0_i32 = arith.constant 0 : i32
    %0 = arith.cmpi eq, %arg2, %c0_i32 : i32
    %1 = arith.extui %0 : i1 to i32
    %c0_i32_0 = arith.constant 0 : i32
    %2 = arith.cmpi ne, %1, %c0_i32_0 : i32
    scf.if %2 {
      %c0_9 = arith.constant 0 : index
      %c0_10 = arith.constant 0 : index
      %15 = vector.load %arg5[%c0_9, %c0_10] : memref<1x128xf32, #tpu.memory_space<vmem>>, vector<1x128xf32>
      %16 = vector.shape_cast %15 : vector<1x128xf32> to vector<1x128xf32>
      %17 = vector.broadcast %16 : vector<1x128xf32> to vector<8x128xf32>
      %c0_11 = arith.constant 0 : index
      %c0_12 = arith.constant 0 : index
      %18 = vector.load %arg7[%c0_11, %c0_12] : memref<8x128xf32, #tpu.memory_space<vmem>>, vector<8x128xf32>
      tpu.vector_store %arg7[%c0_11, %c0_12], %17 {strides = array<i32>} : memref<8x128xf32, #tpu.memory_space<vmem>>, vector<8x128xf32>,
    } else {
    }
    %c128_i32 = arith.constant 128 : i32
    %3 = arith.muli %arg2, %c128_i32 : i32
    %4 = tpu.assume_multiple %3, 128 : i32
    %c0 = arith.constant 0 : index
    %5 = arith.index_cast %4 : i32 to index
    %6 = vector.load %arg3[%c0, %5] : memref<8x128xf32, #tpu.memory_space<vmem>>, vector<8x128xf32>
    %c0_1 = arith.constant 0 : index
    %c0_2 = arith.constant 0 : index
    %7 = vector.load %arg7[%c0_1, %c0_2] : memref<8x128xf32, #tpu.memory_space<vmem>>, vector<8x128xf32>
    %c0_3 = arith.constant 0 : index
    %c0_4 = arith.constant 0 : index
    %8 = vector.load %arg4[%c0_3, %c0_4] : memref<128x128xf32, #tpu.memory_space<vmem>>, vector<128x128xf32>
    %cst = arith.constant dense<0.000000e+00> : vector<8x128xf32>
    %9 = tpu.matmul %6, %8, %cst {dimension_numbers = #tpu.dot_dimension_numbers<[1], [0], [0], [1], [0, 0, 1, 1], [], []>} : vector<8x128xf32>, vector<128x128xf32>, vector<8x128xf32> -> vector<8x128xf32>
    %10 = arith.addf %7, %9 : vector<8x128xf32>
    %c0_5 = arith.constant 0 : index
    %c0_6 = arith.constant 0 : index
    %11 = vector.load %arg7[%c0_5, %c0_6] : memref<8x128xf32, #tpu.memory_space<vmem>>, vector<8x128xf32>
    tpu.vector_store %arg7[%c0_5, %c0_6], %10 {strides = array<i32>} : memref<8x128xf32, #tpu.memory_space<vmem>>, vector<8x128xf32>,
    %c0_i32_7 = arith.constant 0 : i32
    %12 = arith.cmpi eq, %arg2, %c0_i32_7 : i32
    %13 = arith.extui %12 : i1 to i32
    %c0_i32_8 = arith.constant 0 : i32
    %14 = arith.cmpi ne, %13, %c0_i32_8 : i32
    scf.if %14 {
      %c0_9 = arith.constant 0 : index
      %c0_10 = arith.constant 0 : index
      %15 = vector.load %arg7[%c0_9, %c0_10] : memref<8x128xf32, #tpu.memory_space<vmem>>, vector<8x128xf32>
      %cst_11 = arith.constant -8.000000e+01 : f32
      %16 = vector.broadcast %cst_11 : f32 to vector<8x128xf32>
      %17 = arith.maximumf %15, %16 : vector<8x128xf32>
      %cst_12 = arith.constant 0.000000e+00 : f32
      %18 = vector.broadcast %cst_12 : f32 to vector<8x128xf32>
      %19 = arith.subf %18, %17 : vector<8x128xf32>
      %20 = math.exp %19 : vector<8x128xf32>
      %cst_13 = arith.constant 1.000000e+00 : f32
      %21 = vector.broadcast %cst_13 : f32 to vector<8x128xf32>
      %22 = arith.addf %21, %20 : vector<8x128xf32>
      %23 = tpu.reciprocal %22 {approx = true} : vector<8x128xf32> -> vector<8x128xf32>
      %cst_14 = arith.constant 1.000000e+00 : f32
      %24 = vector.broadcast %cst_14 : f32 to vector<1x128xf32>
      %cst_15 = arith.constant dense<0.000000e+00> : vector<1x8xf32>
      %25 = tpu.matmul %24, %23, %cst_15 {dimension_numbers = #tpu.dot_dimension_numbers<[1], [1], [0], [0], [0, 0, 1, 0], [], []>} : vector<1x128xf32>, vector<8x128xf32>, vector<1x8xf32> -> vector<1x8xf32>
      %26 = vector.shape_cast %25 : vector<1x8xf32> to vector<1x1x8xf32>
      %c0_16 = arith.constant 0 : index
      %c0_17 = arith.constant 0 : index
      %c0_18 = arith.constant 0 : index
      %27 = vector.load %arg6[%c0_16, %c0_17, %c0_18] : memref<1x1x8xf32, #tpu.memory_space<vmem>>, vector<1x1x8xf32>
      tpu.vector_store %arg6[%c0_16, %c0_17, %c0_18], %26 {strides = array<i32>} : memref<1x1x8xf32, #tpu.memory_space<vmem>>, vector<1x1x8xf32>,
    } else {
    }
    return
  }
  func.func @transform_0(%arg0: i32, %arg1: i32, %arg2: i32) -> (i32, i32) {
    %c0_i32 = arith.constant 0 : i32
    %c0_i32_0 = arith.constant 0 : i32
    return %arg0, %c0_i32 : i32, i32
  }
  func.func @transform_1(%arg0: i32, %arg1: i32, %arg2: i32) -> (i32, i32) {
    %c0_i32 = arith.constant 0 : i32
    return %arg2, %arg1 : i32, i32
  }
  func.func @transform_2(%arg0: i32, %arg1: i32, %arg2: i32) -> (i32, i32) {
    %c0_i32 = arith.constant 0 : i32
    %c0_i32_0 = arith.constant 0 : i32
    return %c0_i32, %arg1 : i32, i32
  }
  func.func @transform_3(%arg0: i32, %arg1: i32, %arg2: i32) -> (i32, i32, i32) {
    %c0_i32 = arith.constant 0 : i32
    %c0_i32_0 = arith.constant 0 : i32
    return %arg1, %c0_i32, %arg0 : i32, i32, i32
  }
}

</mosaic_0001>

<bundles_post_ra>
// kernel: tpu_custom_call.1
= control target key start
LH: loop header
LB: loop body
LE: loop exit
PB: predicated region body
PF: predicated region fallthrough
CT: control target
= control target key end

     0   :  { %8 = vsyncpa [#allocation4], 0  ;;  %s490_s0 = inlined_call_operand.hbm [shape: f32[8,128], index: 0, kind: input, shape index: {}]   ;;  %s491_s1 = inlined_call_operand.hbm [shape: f32[128,128], index: 1, kind: input, shape index: {}]   ;;  %s492_s2 = inlined_call_operand.vmem [shape: f32[1,128], index: 2, kind: input, shape index: {}]   ;;  %s493_s3 = inlined_call_operand.hbm [shape: f32[1,1,8], index: 3, kind: output, shape index: {}]  }
   0x1   :  { %9 = vsyncpa [#allocation7], 0 }
   0x2   :  { %10 = vsyncpa [#allocation5], 0  ;;  %s415_s12 = smov [#allocation3]   ;;  %s416_s14 = smov [#allocation6]  }
   0x3   :  { %s17_s13 = sshll.u32 %s415_s12, 4  ;;  %s26_s15 = sshll.u32 %s416_s14, 4  ;;  %s18_s13 = int_to_ptr.vmem [resolvable:$true] %s17_s13  ;;  %s444_s15 = int_to_ptr.vmem [resolvable:$true] %s26_s15 }
   0x4   :  { %s343_s18 = scalar_lea.hbm %s490_s0, 128 }
   0x5   :  { %p344_p0 = scmp.ne.s32.totalorder %s490_s0, %s343_s18  ;;  %p347_p1 = scmp.lt.u32.totalorder %s343_s18, %s490_s0 }
   0x7   :  { %p349_p2 = pnand %p347_p1, %p344_p0 }
   0x9   :  { %352 = shalt.err (!%p349_p2)
}
   0xa   :  { %s353_s23 = scalar_lea.vmem %s18_s13, 128  ;;  %p358_p4 = scmp.lt.s32.totalorder %s18_s13, %s18_s13 }
   0xb   :  { %p354_p3 = scmp.ne.s32.totalorder %s18_s13, %s353_s23  ;;  %p359_p5 = scmp.lt.s32.totalorder %s353_s23, %s353_s23 }
   0xd   :  { %p360_p6 = por %p359_p5, %p358_p4 }
   0xf   :  { %p361_p7 = pnand %p360_p6, %p354_p3 }
  0x11   :  { %364 = shalt.err (!%p361_p7)
}
  0x12   :  { %20 = dma.hbm_to_vmem [thread:$0]  %s490_s0, 128, %s18_s13, [#allocation4]  }
  0x13   :  { %s365_s28 = scalar_lea.hbm %s491_s1, 2048 }
  0x14   :  { %p366_p8 = scmp.ne.s32.totalorder %s491_s1, %s365_s28  ;;  %p369_p9 = scmp.lt.u32.totalorder %s365_s28, %s491_s1 }
  0x16   :  { %p371_p10 = pnand %p369_p9, %p366_p8 }
  0x18   :  { %374 = shalt.err (!%p371_p10)
}
  0x19   :  { %s375_s6 = scalar_lea.vmem %s444_s15, 2048  ;;  %p380_p12 = scmp.lt.s32.totalorder %s444_s15, %s444_s15 }
  0x1a   :  { %p376_p11 = scmp.ne.s32.totalorder %s444_s15, %s375_s6  ;;  %p381_p13 = scmp.lt.s32.totalorder %s375_s6, %s375_s6 }
  0x1c   :  { %p382_p0 = por %p381_p13, %p380_p12 }
  0x1e   :  { %p383_p1 = pnand %p382_p0, %p376_p11 }
  0x20   :  { %386 = shalt.err (!%p383_p1)
}
  0x21   :  { %s417_s0 = smov 128   ;;  %s418_s7 = smov 8  }
  0x22   :  { %32 = dma.hbm_to_vmem [thread:$0]  %s491_s1, 2048, %s444_s15, [#allocation7], %s417_s0, %s417_s0, %s418_s7  }
  0x23   :  { %409 = dma.done.wait [#allocation4], 128  }
  0x24   :  { %410 = vsyncadd [#allocation4], 4294967168 }
  0x25   :  { %411 = dma.done.wait [#allocation7], 2048  }
  0x26   :  { %412 = vsyncadd [#allocation7], 4294965248  ;;  %v419_v0 = vmov 0.0|0.0   ;;  %vm420_vm0 = vmmov 0   ;;  %v421_v1 = vmov 0.0   ;;  %v59_v2 = vld [vmem:[#allocation6] sm:$0xff] }
  0x27   :  { %306 = vmatprep.subr.bf16.mxu0 %v419_v0  ;;  %298 = vmatprep.mubr.msk.f32.mxu0 %vm420_vm0, %v421_v1  ;;  %v60_v3 = vld [vmem:[#allocation6 + $0x8] sm:$0xff]  ;;  %v61_v4 = vld [vmem:[#allocation6 + $0x10] sm:$0xff]  ;;  %v62_v6 = vld [vmem:[#allocation6 + $0x18] sm:$0xff]  ;;  %v422_v37 = vmov 1.0   ;;  %s423_s11 = smov [#allocation8]   ;;  %vm227_vm1 = vcmask 57344  }
  0x28   :  { %301 = vmatprep.subr.mxu1 %v421_v1  ;;  %303 = vmatprep.mubr.msk.f32.mxu1 %vm420_vm0, %v421_v1  ;;  %v307_v5 = vpack.c.bf16 %v60_v3, %v59_v2  ;;  %v310_v7 = vpack.c.bf16 %v62_v6, %v61_v4  ;;  %v63_v8 = vld [vmem:[#allocation6 + $0x20] sm:$0xff]  ;;  %v64_v9 = vld [vmem:[#allocation6 + $0x28] sm:$0xff]  ;;  %v65_v11 = vld [vmem:[#allocation6 + $0x30] sm:$0xff]  ;;  %s235_s12 = sshll.u32 %s423_s11, 4  ;;  %s236_s12 = int_to_ptr.vmem [resolvable:$true] %s235_s12 }
  0x29   :  { %v313_v10 = vpack.c.bf16 %v64_v9, %v63_v8  ;;  %v66_v12 = vld [vmem:[#allocation6 + $0x38] sm:$0xff]  ;;  %v67_v14 = vld [vmem:[#allocation6 + $0x40] sm:$0xff]  ;;  %v68_v15 = vld [vmem:[#allocation6 + $0x48] sm:$0xff]  ;;  %s391_s13 = scalar_lea.vmem %s236_s12, 32  ;;  %p392_p3 = scmp.lt.s32.totalorder %s236_s12, %s236_s12 }
  0x2a   :  { %308 = vmatpush3.bf16.msra.mxu0 %v307_v5  ;;  %v316_v13 = vpack.c.bf16 %v66_v12, %v65_v11  ;;  %v319_v16 = vpack.c.bf16 %v68_v15, %v67_v14  ;;  %v69_v17 = vld [vmem:[#allocation6 + $0x50] sm:$0xff]  ;;  %v70_v18 = vld [vmem:[#allocation6 + $0x58] sm:$0xff]  ;;  %v71_v20 = vld [vmem:[#allocation6 + $0x60] sm:$0xff] }
  0x2b   :  { %309 = vmatprep.subr.bf16.mxu0 %v419_v0  ;;  %v322_v19 = vpack.c.bf16 %v70_v18, %v69_v17  ;;  %v72_v21 = vld [vmem:[#allocation6 + $0x68] sm:$0xff]  ;;  %v73_v23 = vld [vmem:[#allocation6 + $0x70] sm:$0xff]  ;;  %v74_v24 = vld [vmem:[#allocation6 + $0x78] sm:$0xff] }
  0x2c   :  { %v325_v22 = vpack.c.bf16 %v72_v21, %v71_v20  ;;  %v328_v25 = vpack.c.bf16 %v74_v24, %v73_v23  ;;  %v57_v26 = vld [vmem:[#allocation3] sm:$0xff] }
  0x2d   :  { %v246_v27 = vld [vmem:[%s492_s2] ss:$0 sm:$0xff]  ;;  %s387_s2 = scalar_lea.vmem %s236_s12, 16 }
  0x2e   :  { %311 = vmatpush3.bf16.msra.mxu0 %v310_v7  ;;  %p388_p2 = scmp.ne.s32.totalorder %s236_s12, %s387_s2  ;;  %p393_p4 = scmp.lt.s32.totalorder %s391_s13, %s387_s2 }
  0x2f   :  { %312 = vmatprep.subr.bf16.mxu0 %v419_v0 }
  0x30   :  { %p394_p5 = por %p393_p4, %p392_p3 }
  0x32   :  { %314 = vmatpush3.bf16.msra.mxu0 %v313_v10  ;;  %p395_p6 = pnand %p394_p5, %p388_p2 }
  0x33   :  { %315 = vmatprep.subr.bf16.mxu0 %v419_v0 }
  0x36   :  { %317 = vmatpush3.bf16.msra.mxu0 %v316_v13 }
  0x37   :  { %318 = vmatprep.subr.bf16.mxu0 %v419_v0 }
  0x3a   :  { %320 = vmatpush3.bf16.msra.mxu0 %v319_v16 }
  0x3b   :  { %321 = vmatprep.subr.bf16.mxu0 %v419_v0 }
  0x3e   :  { %323 = vmatpush3.bf16.msra.mxu0 %v322_v19 }
  0x3f   :  { %324 = vmatprep.subr.bf16.mxu0 %v419_v0 }
  0x42   :  { %326 = vmatpush3.bf16.msra.mxu0 %v325_v22 }
  0x43   :  { %327 = vmatprep.subr.bf16.mxu0 %v419_v0 }
  0x46   :  { %329 = vmatpush3.bf16.msra.mxu0 %v328_v25 }
  0x49   :  { %299 = vmatmul.mubr.f32.vlgmr.msra.gmra.mrb[0].mxu0 %v57_v26 }
 0x11c   :  { %v141_v28 = vpop.f32.mrb[0].mxu0 }
 0x11d   :  { %v145_v29 = vadd.f32 %v246_v27, %v141_v28  ;;  %v300_v30 = vpop.f32.mrb[1].mxu0 }
 0x11f   :  { %v151_v31 = vmax.f32 %v145_v29, -80.0 }
 0x121   :  { %v152_v32 = vsub.f32 0.0, %v151_v31 }
 0x123   :  { %v153_v33 = vmul.f32 1.442695, %v152_v32 }
 0x125   :  { %339 = vpow2.f32 %v153_v33 }
 0x12f   :  { %v340_v34 = vpop.eup %339 }
 0x130   :  { %v155_v35 = vadd.f32 1.0, %v340_v34 }
 0x132   :  { %341 = vrcp.f32 %v155_v35 }
 0x13c   :  { %v342_v36 = vpop.eup %341 }
 0x13d   :  { %302 = vmatpush3.xpose.msra.mxu1 %v342_v36 }
 0x140   :  { %304 = vmatmul.mubr.f32.vlgmr.msra.gmra.mrb[0].mxu1 %v422_v37 }
 0x213   :  { %v223_v38 = vpop.f32.mrb[0].mxu1 }
 0x214   :  { %v305_v39 = vpop.f32.mrb[1].mxu1  ;;  %228 = vst.msk [vmem:[#allocation8] sm:$0x1] %vm227_vm1, %v223_v38 }
 0x215   :  { %398 = shalt.err (!%p395_p6)
}
 0x216   :  { %s399_s16 = scalar_lea.hbm %s493_s3, 16 }
 0x217   :  { %p400_p7 = scmp.ne.s32.totalorder %s493_s3, %s399_s16  ;;  %p403_p8 = scmp.lt.u32.totalorder %s399_s16, %s493_s3 }
 0x219   :  { %p405_p9 = pnand %p403_p8, %p400_p7 }
 0x21b   :  { %408 = shalt.err (!%p405_p9)
}
 0x21c   :  { %238 = dma.vmem_to_hbm [thread:$0]  %s236_s12, 16, %s493_s3, [#allocation5]  }
 0x21d   :  { %413 = dma.done.wait [#allocation5], 16  }
 0x21e   :  { %414 = vsyncadd [#allocation5], 4294967280 }
 0x21f   :  { %242 = vsyncpa [#allocation4], 1 }
 0x220   :  { %243 = vsyncpa [#allocation7], 1 }
 0x221   :  { %244 = vsyncpa [#allocation5], 1 }

</bundles_post_ra>
